<compile_context>
chip_gen: v5e
topology: v5e:2x2
jax: 0.10.0
libtpu: 0.0.40
codegen_flags: <defaults>
</compile_context>

<pallas_src>
import math

import jax
import jax.numpy as jnp
from jax import lax
from jax.experimental import pallas as pl
from jax.experimental.pallas import tpu as pltpu

STATE_DIM = 8
ACTION_DIM = 4
IN_DIM = STATE_DIM + ACTION_DIM
HIDDEN = 256


def _q_mlp_kernel(x_ref, w1_ref, b1_ref, w2_ref, b2_ref, w3_ref, b3_ref, o_ref):
    """One batch tile of the 3-layer MLP; bf16 MXU matmuls, f32 accumulation."""
    # Layer 1: single fused dot over the packed (s‖a) operand, K = 12.
    h1 = jnp.dot(x_ref[...], w1_ref[...], preferred_element_type=jnp.float32)
    h1 = jnp.maximum(h1 + b1_ref[...], 0.0)                      # f32

    # Layer 2: the only real compute (batch_tile x 256 x 256), bf16 operands.
    h2 = jnp.dot(h1.astype(jnp.bfloat16), w2_ref[...],
                 preferred_element_type=jnp.float32)
    h2 = jnp.maximum(h2 + b2_ref[...], 0.0)                      # f32

    # Layer 3 (out_features = 1): M=1 matmul producing a lane-dense
    # (1, batch_tile) row directly -- no sublane->lane relayout in the epilogue.
    out = lax.dot_general(w3_ref[...], h2,
                          dimension_numbers=(((1,), (1,)), ((), ())),
                          preferred_element_type=jnp.float32)    # (1, batch_tile)
    o_ref[...] = (out + b3_ref[0]).astype(o_ref.dtype)


def _choose_batch_tile(b, max_tile=1024):
    """Multiple of 128, capped at max_tile, >= 2 grid steps when batch > 128."""
    b128 = pl.cdiv(b, 128) * 128
    if b128 <= 128:
        return 128
    half = (b128 // 2) // 128 * 128     # keep >= 2 tiles for v7x's 2 TensorCores
    return max(128, min(max_tile, half))


def q_forward(s, a, params, *, batch_tile=None, max_tile=1024):
    """Pallas implementation of Q.forward(s, a)."""
    s = s.reshape(-1, STATE_DIM)
    a = a.reshape(-1, ACTION_DIM)
    b = s.shape[0]

    w1, b1, w2, b2, w3, b3 = params

    # Pre-pack s‖a in the wrapper (cheap HBM-side concat) and cast the MXU
    # operands to bf16; accumulation stays f32 inside the kernel.
    x = jnp.concatenate([s, a], axis=-1).astype(jnp.bfloat16)    # (b, 12)

    if batch_tile is None:
        batch_tile = _choose_batch_tile(b, max_tile)
    b_pad = pl.cdiv(b, batch_tile) * batch_tile
    if b_pad != b:
        x = jnp.pad(x, ((0, b_pad - b), (0, 0)))

    w1_bf = w1.astype(jnp.bfloat16)                              # (12, 256)
    w2_bf = w2.astype(jnp.bfloat16)                              # (256, 256)
    b1_f = b1.reshape(1, HIDDEN).astype(jnp.float32)
    b2_f = b2.reshape(1, HIDDEN).astype(jnp.float32)
    w3_row = w3.reshape(1, HIDDEN).astype(jnp.float32)           # (1, 256)
    b3_s = b3.reshape(1).astype(jnp.float32)                     # SMEM scalar

    num_tiles = b_pad // batch_tile
    flops = 2 * b_pad * (IN_DIM * HIDDEN + HIDDEN * HIDDEN + HIDDEN)
    bytes_accessed = (b_pad * (IN_DIM * 2 + 4)                   # x in, out
                      + (IN_DIM * HIDDEN + HIDDEN * HIDDEN) * 2  # bf16 weights
                      + (3 * HIDDEN + 1) * 4)                    # f32 biases/w3

    out = pl.pallas_call(
        _q_mlp_kernel,
        out_shape=jax.ShapeDtypeStruct((1, b_pad), jnp.float32),
        grid_spec=pltpu.PrefetchScalarGridSpec(
            num_scalar_prefetch=0,
            grid=(num_tiles,),
            in_specs=[
                pl.BlockSpec((batch_tile, IN_DIM), lambda i: (i, 0)),      # x tile
                pl.BlockSpec((IN_DIM, HIDDEN), lambda i: (0, 0)),          # W1
                pl.BlockSpec((1, HIDDEN), lambda i: (0, 0)),               # b1
                pl.BlockSpec((HIDDEN, HIDDEN), lambda i: (0, 0)),          # W2
                pl.BlockSpec((1, HIDDEN), lambda i: (0, 0)),               # b2
                pl.BlockSpec((1, HIDDEN), lambda i: (0, 0)),               # w3 row
                pl.BlockSpec(memory_space=pltpu.MemorySpace.SMEM),         # b3
            ],
            out_specs=pl.BlockSpec((1, batch_tile), lambda i: (0, i)),
        ),
        compiler_params=pltpu.CompilerParams(
            dimension_semantics=("parallel",)),
        cost_estimate=pl.CostEstimate(flops=flops, transcendentals=0,
                                      bytes_accessed=bytes_accessed),
    )(x, w1_bf, b1_f, w2_bf, b2_f, w3_row, b3_s)

    return out.reshape(-1, 1)[:b]


def init_params(key):
    """Deterministic init mimicking nn.Linear's U(-1/sqrt(fan_in), 1/sqrt(fan_in))."""
    def linear(key, fan_in, fan_out):
        kw, kb = jax.random.split(key)
        bound = 1.0 / math.sqrt(fan_in)
        w = jax.random.uniform(kw, (fan_in, fan_out), jnp.float32, -bound, bound)
        b = jax.random.uniform(kb, (1, fan_out), jnp.float32, -bound, bound)
        return w, b

    k1, k2, k3 = jax.random.split(key, 3)
    w1, b1 = linear(k1, IN_DIM, HIDDEN)
    w2, b2 = linear(k2, HIDDEN, HIDDEN)
    w3, b3 = linear(k3, HIDDEN, 1)
    return (w1, b1, w2, b2, w3, b3)


def q_reference(s, a, params):
    """Pure-JAX f32 reference for correctness check."""
    w1, b1, w2, b2, w3, b3 = params
    x = jnp.concatenate([s.reshape(-1, STATE_DIM), a.reshape(-1, ACTION_DIM)], -1)
    h1 = jnp.maximum(x @ w1 + b1, 0.0)
    h2 = jnp.maximum(h1 @ w2 + b2, 0.0)
    return h2 @ w3 + b3


if __name__ == "__main__":
    key = jax.random.PRNGKey(0)
    kp, ks, ka = jax.random.split(key, 3)

    params = init_params(kp)

    # Small test (single grid step, padded batch). bf16 MXU operands -> loose tol.
    batch = 4
    s = jax.random.normal(ks, (batch, STATE_DIM), jnp.float32)
    a = jax.random.normal(ka, (batch, ACTION_DIM), jnp.float32)

    out = jax.block_until_ready(q_forward(s, a, params))
    ref = q_reference(s, a, params)
    assert out.shape == (batch, 1), out.shape
    assert jnp.allclose(out, ref, atol=5e-2, rtol=5e-2), (out, ref)

    # Multi-tile test (exercises the batch grid and lane-dense output indexing).
    batch2 = 300
    s2 = jax.random.normal(ks, (batch2, STATE_DIM), jnp.float32)
    a2 = jax.random.normal(ka, (batch2, ACTION_DIM), jnp.float32)
    out2 = jax.block_until_ready(q_forward(s2, a2, params))
    ref2 = q_reference(s2, a2, params)
    assert out2.shape == (batch2, 1), out2.shape
    assert jnp.allclose(out2, ref2, atol=5e-2, rtol=5e-2)

    print("KERNEL_OK")
</pallas_src>

<mosaic_0001>
module attributes {stable_mosaic.version = 11 : i64} {
  func.func @_q_mlp_kernel(%arg0: i32, %arg1: memref<128x12xbf16, #tpu.memory_space<vmem>>, %arg2: memref<12x256xbf16, #tpu.memory_space<vmem>>, %arg3: memref<1x256xf32, #tpu.memory_space<vmem>>, %arg4: memref<256x256xbf16, #tpu.memory_space<vmem>>, %arg5: memref<1x256xf32, #tpu.memory_space<vmem>>, %arg6: memref<1x256xf32, #tpu.memory_space<vmem>>, %arg7: memref<1xf32, #tpu.memory_space<smem>>, %arg8: memref<1x128xf32, #tpu.memory_space<vmem>>) attributes {dimension_semantics = [#tpu.dimension_semantics<parallel>], iteration_bounds = array<i64: 1>, scalar_prefetch = 0 : i64, scratch_operands = 0 : i64, tpu.core_type = #tpu.core_type<tc>, window_params = [{transform_indices = @transform_0, window_bounds = array<i64: 128, 12>}, {pipeline_mode = #tpu.pipeline_mode<synchronous>, transform_indices = @transform_1, window_bounds = array<i64: 12, 256>}, {pipeline_mode = #tpu.pipeline_mode<synchronous>, transform_indices = @transform_2, window_bounds = array<i64: 1, 256>}, {pipeline_mode = #tpu.pipeline_mode<synchronous>, transform_indices = @transform_3, window_bounds = array<i64: 256, 256>}, {pipeline_mode = #tpu.pipeline_mode<synchronous>, transform_indices = @transform_4, window_bounds = array<i64: 1, 256>}, {pipeline_mode = #tpu.pipeline_mode<synchronous>, transform_indices = @transform_5, window_bounds = array<i64: 1, 256>}, {transform_indices = @transform_6, window_bounds = array<i64: 1>}, {transform_indices = @transform_7, window_bounds = array<i64: 1, 128>}]} {
    %c0 = arith.constant 0 : index
    %c0_0 = arith.constant 0 : index
    %0 = vector.load %arg1[%c0, %c0_0] : memref<128x12xbf16, #tpu.memory_space<vmem>>, vector<128x12xbf16>
    %c0_1 = arith.constant 0 : index
    %c0_2 = arith.constant 0 : index
    %1 = vector.load %arg2[%c0_1, %c0_2] : memref<12x256xbf16, #tpu.memory_space<vmem>>, vector<12x256xbf16>
    %cst = arith.constant dense<0.000000e+00> : vector<128x256xf32>
    %2 = tpu.matmul %0, %1, %cst {dimension_numbers = #tpu.dot_dimension_numbers<[1], [0], [0], [1], [0, 0, 1, 1], [], []>} : vector<128x12xbf16>, vector<12x256xbf16>, vector<128x256xf32> -> vector<128x256xf32>
    %c0_3 = arith.constant 0 : index
    %c0_4 = arith.constant 0 : index
    %3 = vector.load %arg3[%c0_3, %c0_4] : memref<1x256xf32, #tpu.memory_space<vmem>>, vector<1x256xf32>
    %4 = vector.broadcast %3 : vector<1x256xf32> to vector<128x256xf32>
    %5 = arith.addf %2, %4 : vector<128x256xf32>
    %cst_5 = arith.constant 0.000000e+00 : f32
    %6 = vector.broadcast %cst_5 : f32 to vector<128x256xf32>
    %7 = arith.maximumf %5, %6 : vector<128x256xf32>
    %8 = arith.truncf %7 : vector<128x256xf32> to vector<128x256xbf16>
    %c0_6 = arith.constant 0 : index
    %c0_7 = arith.constant 0 : index
    %9 = vector.load %arg4[%c0_6, %c0_7] : memref<256x256xbf16, #tpu.memory_space<vmem>>, vector<256x256xbf16>
    %cst_8 = arith.constant dense<0.000000e+00> : vector<128x256xf32>
    %10 = tpu.matmul %8, %9, %cst_8 {dimension_numbers = #tpu.dot_dimension_numbers<[1], [0], [0], [1], [0, 0, 1, 1], [], []>} : vector<128x256xbf16>, vector<256x256xbf16>, vector<128x256xf32> -> vector<128x256xf32>
    %c0_9 = arith.constant 0 : index
    %c0_10 = arith.constant 0 : index
    %11 = vector.load %arg5[%c0_9, %c0_10] : memref<1x256xf32, #tpu.memory_space<vmem>>, vector<1x256xf32>
    %12 = vector.broadcast %11 : vector<1x256xf32> to vector<128x256xf32>
    %13 = arith.addf %10, %12 : vector<128x256xf32>
    %cst_11 = arith.constant 0.000000e+00 : f32
    %14 = vector.broadcast %cst_11 : f32 to vector<128x256xf32>
    %15 = arith.maximumf %13, %14 : vector<128x256xf32>
    %c0_12 = arith.constant 0 : index
    %c0_13 = arith.constant 0 : index
    %16 = vector.load %arg6[%c0_12, %c0_13] : memref<1x256xf32, #tpu.memory_space<vmem>>, vector<1x256xf32>
    %cst_14 = arith.constant dense<0.000000e+00> : vector<1x128xf32>
    %17 = tpu.matmul %16, %15, %cst_14 {dimension_numbers = #tpu.dot_dimension_numbers<[1], [1], [0], [0], [0, 0, 1, 0], [], []>} : vector<1x256xf32>, vector<128x256xf32>, vector<1x128xf32> -> vector<1x128xf32>
    %c0_15 = arith.constant 0 : index
    %18 = memref.load %arg7[%c0_15] : memref<1xf32, #tpu.memory_space<smem>>
    %19 = vector.broadcast %18 : f32 to vector<1x128xf32>
    %20 = arith.addf %17, %19 : vector<1x128xf32>
    %c0_16 = arith.constant 0 : index
    %c0_17 = arith.constant 0 : index
    %21 = vector.load %arg8[%c0_16, %c0_17] : memref<1x128xf32, #tpu.memory_space<vmem>>, vector<1x128xf32>
    tpu.vector_store %arg8[%c0_16, %c0_17], %20 {strides = array<i32>} : memref<1x128xf32, #tpu.memory_space<vmem>>, vector<1x128xf32>,
    return
  }
  func.func @transform_0(%arg0: i32) -> (i32, i32) {
    %c0_i32 = arith.constant 0 : i32
    %c0_i32_0 = arith.constant 0 : i32
    return %arg0, %c0_i32 : i32, i32
  }
  func.func @transform_1(%arg0: i32) -> (i32, i32) {
    %c0_i32 = arith.constant 0 : i32
    %c0_i32_0 = arith.constant 0 : i32
    %c0_i32_1 = arith.constant 0 : i32
    return %c0_i32, %c0_i32_0 : i32, i32
  }
  func.func @transform_2(%arg0: i32) -> (i32, i32) {
    %c0_i32 = arith.constant 0 : i32
    %c0_i32_0 = arith.constant 0 : i32
    %c0_i32_1 = arith.constant 0 : i32
    return %c0_i32, %c0_i32_0 : i32, i32
  }
  func.func @transform_3(%arg0: i32) -> (i32, i32) {
    %c0_i32 = arith.constant 0 : i32
    %c0_i32_0 = arith.constant 0 : i32
    %c0_i32_1 = arith.constant 0 : i32
    return %c0_i32, %c0_i32_0 : i32, i32
  }
  func.func @transform_4(%arg0: i32) -> (i32, i32) {
    %c0_i32 = arith.constant 0 : i32
    %c0_i32_0 = arith.constant 0 : i32
    %c0_i32_1 = arith.constant 0 : i32
    return %c0_i32, %c0_i32_0 : i32, i32
  }
  func.func @transform_5(%arg0: i32) -> (i32, i32) {
    %c0_i32 = arith.constant 0 : i32
    %c0_i32_0 = arith.constant 0 : i32
    %c0_i32_1 = arith.constant 0 : i32
    return %c0_i32, %c0_i32_0 : i32, i32
  }
  func.func @transform_6(%arg0: i32) -> i32 {
    %c0_i32 = arith.constant 0 : i32
    %c0_i32_0 = arith.constant 0 : i32
    return %c0_i32 : i32
  }
  func.func @transform_7(%arg0: i32) -> (i32, i32) {
    %c0_i32 = arith.constant 0 : i32
    %c0_i32_0 = arith.constant 0 : i32
    return %c0_i32, %arg0 : i32, i32
  }
}

</mosaic_0001>

<bundles_post_ra>
// kernel: tpu_custom_call.1
= control target key start
LH: loop header
LB: loop body
LE: loop exit
PB: predicated region body
PF: predicated region fallthrough
CT: control target
= control target key end

     0   :  { %13 = vsyncpa [#allocation4], 0  ;;  %s1320_s0 = inlined_call_operand.vmem [shape: bf16[128,12], index: 0, kind: input, shape index: {}]   ;;  %s1321_s1 = inlined_call_operand.vmem [shape: bf16[12,256], index: 1, kind: input, shape index: {}]   ;;  %s1322_s2 = inlined_call_operand.vmem [shape: f32[1,256], index: 2, kind: input, shape index: {}]   ;;  %s1323_s3 = inlined_call_operand.hbm [shape: bf16[256,256], index: 3, kind: input, shape index: {}]   ;;  %s1324_s4 = inlined_call_operand.vmem [shape: f32[1,256], index: 4, kind: input, shape index: {}]   ;;  %s1325_s5 = inlined_call_operand.vmem [shape: f32[1,256], index: 5, kind: input, shape index: {}]   ;;  %s1326_s6 = inlined_call_operand.<no memory space> [shape: f32[1], index: 6, kind: input, shape index: {}]   ;;  %s1327_s7 = inlined_call_operand.hbm [shape: f32[1,128], index: 7, kind: output, shape index: {}]  }
   0x1   :  { %14 = vsyncpa [#allocation5], 0  ;;  %s25_s26 = sshll.u32 %s1323_s3, 4  ;;  %s1071_s27 = smov [#allocation3]   ;;  %s26_s26 = int_to_ptr.hbm [resolvable:$true] %s25_s26 }
   0x2   :  { %s27_s28 = sshll.u32 %s1071_s27, 4  ;;  %s1072_s29 = smov 128   ;;  %s28_s28 = int_to_ptr.vmem [resolvable:$true] %s27_s28 }
   0x3   :  { %s1073_s30 = smov 8  }
   0x4   :  { %33 = dma.hbm_to_vmem [thread:$0]  %s26_s26, 4096, %s28_s28, [#allocation4], %s1072_s29, %s1072_s29, %s1073_s30  }
   0x5   :  { %1067 = dma.done.wait [#allocation4], 4096  }
   0x6   :  { %1068 = vsyncadd [#allocation4], 4294963200  ;;  %vm142_vm0 = vcmask 1045504   ;;  %v821_v0 = vld [vmem:[%s1321_s1] sm:$0xf]  ;;  %vm117_vm1 = vcmask 97280  }
   0x7   :  { %v980_v1 = vld [vmem:[%s1321_s1 + $0x4] sm:$0x30]  ;;  %v979_v2 = vld [vmem:[%s1321_s1 + $0x4] sm:$0xf]  ;;  %v823_v4 = vld [vmem:[%s1321_s1 + $0x8] sm:$0x30] }
   0x8   :  { %v822_v3 = vor.u32 %v980_v1, %v821_v0  ;;  %v826_v5 = vor.u32 %v979_v2, %v823_v4  ;;  %v971_v7 = vld [vmem:[%s1320_s0] sm:$0xff]  ;;  %v972_v9 = vld [vmem:[%s1320_s0 + $0x8] sm:$0xff]  ;;  %v973_v10 = vld [vmem:[%s1320_s0 + $0x10] sm:$0xff]  ;;  %s1074_s12 = smov [#allocation6]   ;;  %s777_s14 = sshll.u32 %s1327_s7, 4  ;;  %s778_s14 = int_to_ptr.hbm [resolvable:$true] %s777_s14 }
   0x9   :  { %v976_v11 = vld [vmem:[%s1320_s0 + $0x28] sm:$0xff]  ;;  %v901_v12 = vld [vmem:[#allocation3 + $0x70] sm:$0xf]  ;;  %v996_v13 = vld [vmem:[#allocation3 + $0x74] sm:$0xf0]  ;;  %s775_s3 = sshll.u32 %s1074_s12, 4  ;;  %s776_s3 = int_to_ptr.vmem [resolvable:$true] %s775_s3 }
   0xa   :  { %v144_v6 = vsel %vm142_vm0, %v822_v3, 0  ;;  %v147_v8 = vsel %vm142_vm0, %v826_v5, 0  ;;  %v965_v14 = vld [vmem:[#allocation3 + $0xf0] sm:$0xf]  ;;  %v902_v15 = vor.u32 %v996_v13, %v901_v12  ;;  %v1012_v16 = vld [vmem:[#allocation3 + $0xf4] sm:$0xf0] }
   0xb   :  { %156 = vmatpush.bf16.msra.mxu0 %v144_v6  ;;  %1013 = vmatpush.bf16.msra.mxu2 %v144_v6  ;;  %v995_v17 = vld [vmem:[#allocation3 + $0x74] sm:$0xf]  ;;  %v903_v18 = vld [vmem:[#allocation3 + $0x78] sm:$0xf0]  ;;  %v966_v19 = vor.u32 %v1012_v16, %v965_v14  ;;  %v893_v23 = vld [vmem:[#allocation3 + $0x60] sm:$0xf] }
   0xc   :  { %205 = vmatpush.bf16.msra.mxu1 %v147_v8  ;;  %1014 = vmatpush.bf16.msra.mxu3 %v147_v8  ;;  %v906_v20 = vor.u32 %v995_v17, %v903_v18  ;;  %v1011_v21 = vld [vmem:[#allocation3 + $0xf4] sm:$0xf]  ;;  %v967_v22 = vld [vmem:[#allocation3 + $0xf8] sm:$0xf0]  ;;  %v994_v25 = vld [vmem:[#allocation3 + $0x64] sm:$0xf0] }
   0xd   :  { %v970_v24 = vor.u32 %v1011_v21, %v967_v22  ;;  %v957_v26 = vld [vmem:[#allocation3 + $0xe0] sm:$0xf]  ;;  %v1010_v27 = vld [vmem:[#allocation3 + $0xe4] sm:$0xf0]  ;;  %v894_v28 = vor.u32 %v994_v25, %v893_v23  ;;  %v993_v30 = vld [vmem:[#allocation3 + $0x64] sm:$0xf] }
   0xe   :  { %827 = vmatmul.msk.bf16.vlgmr.msra.gmra.mxu0 %vm117_vm1, %v971_v7  ;;  %832 = vmatmul.msk.bf16.vlgmr.msra.gmra.mxu2 %vm117_vm1, %v976_v11  ;;  %v958_v29 = vor.u32 %v1010_v27, %v957_v26  ;;  %v895_v31 = vld [vmem:[#allocation3 + $0x68] sm:$0xf0]  ;;  %v1009_v32 = vld [vmem:[#allocation3 + $0xe4] sm:$0xf]  ;;  %v885_v35 = vld [vmem:[#allocation3 + $0x50] sm:$0xf] }
   0xf   :  { %835 = vmatmul.msk.bf16.vlgmr.msra.gmra.mxu1 %vm117_vm1, %v971_v7  ;;  %840 = vmatmul.msk.bf16.vlgmr.msra.gmra.mxu3 %vm117_vm1, %v976_v11  ;;  %v898_v33 = vor.u32 %v993_v30, %v895_v31  ;;  %v959_v34 = vld [vmem:[#allocation3 + $0xe8] sm:$0xf0]  ;;  %v992_v36 = vld [vmem:[#allocation3 + $0x54] sm:$0xf0]  ;;  %v949_v38 = vld [vmem:[#allocation3 + $0xd0] sm:$0xf] }
  0x10   :  { %493 = vmatpush.bf16.msrb.mxu2 %v902_v15  ;;  %542 = vmatpush.bf16.msrb.mxu3 %v966_v19  ;;  %v962_v37 = vor.u32 %v1009_v32, %v959_v34  ;;  %v1008_v39 = vld [vmem:[#allocation3 + $0xd4] sm:$0xf0]  ;;  %v991_v40 = vld [vmem:[#allocation3 + $0x54] sm:$0xf]  ;;  %v886_v41 = vor.u32 %v992_v36, %v885_v35  ;;  %v887_v42 = vld [vmem:[#allocation3 + $0x58] sm:$0xf0] }
  0x11   :  { %591 = vmatpush.bf16.msrb.mxu0 %v906_v20  ;;  %640 = vmatpush.bf16.msrb.mxu1 %v970_v24  ;;  %v1007_v43 = vld [vmem:[#allocation3 + $0xd4] sm:$0xf]  ;;  %v951_v44 = vld [vmem:[#allocation3 + $0xd8] sm:$0xf0]  ;;  %v950_v45 = vor.u32 %v1008_v39, %v949_v38  ;;  %v890_v46 = vor.u32 %v991_v40, %v887_v42  ;;  %v877_v47 = vld [vmem:[#allocation3 + $0x40] sm:$0xf] }
  0x12   :  { %v990_v48 = vld [vmem:[#allocation3 + $0x44] sm:$0xf0]  ;;  %v974_v49 = vld [vmem:[%s1320_s0 + $0x18] sm:$0xff]  ;;  %v954_v50 = vor.u32 %v1007_v43, %v951_v44  ;;  %v941_v51 = vld [vmem:[#allocation3 + $0xc0] sm:$0xf] }
  0x13   :  { %v1006_v52 = vld [vmem:[#allocation3 + $0xc4] sm:$0xf0]  ;;  %v989_v53 = vld [vmem:[#allocation3 + $0x44] sm:$0xf]  ;;  %v879_v54 = vld [vmem:[#allocation3 + $0x48] sm:$0xf0]  ;;  %v878_v55 = vor.u32 %v990_v48, %v877_v47 }
  0x14   :  { %494 = vmatpush.bf16.msrb.mxu2 %v894_v28  ;;  %543 = vmatpush.bf16.msrb.mxu3 %v958_v29  ;;  %v1005_v56 = vld [vmem:[#allocation3 + $0xc4] sm:$0xf]  ;;  %v943_v57 = vld [vmem:[#allocation3 + $0xc8] sm:$0xf0]  ;;  %v977_v58 = vld [vmem:[%s1320_s0 + $0x30] sm:$0xff]  ;;  %v942_v59 = vor.u32 %v1006_v52, %v941_v51  ;;  %v882_v60 = vor.u32 %v989_v53, %v879_v54 }
  0x15   :  { %592 = vmatpush.bf16.msrb.mxu0 %v898_v33  ;;  %641 = vmatpush.bf16.msrb.mxu1 %v962_v37  ;;  %v946_v61 = vor.u32 %v1005_v56, %v943_v57  ;;  %v975_v62 = vld [vmem:[%s1320_s0 + $0x20] sm:$0xff]  ;;  %v978_v63 = vld [vmem:[%s1320_s0 + $0x38] sm:$0xff]  ;;  %v869_v0 = vld [vmem:[#allocation3 + $0x30] sm:$0xf] }
  0x16   :  { %v988_v1 = vld [vmem:[#allocation3 + $0x34] sm:$0xf0]  ;;  %v933_v2 = vld [vmem:[#allocation3 + $0xb0] sm:$0xf]  ;;  %v987_v5 = vld [vmem:[#allocation3 + $0x34] sm:$0xf] }
  0x17   :  { %v870_v3 = vor.u32 %v988_v1, %v869_v0  ;;  %v1004_v4 = vld [vmem:[#allocation3 + $0xb4] sm:$0xf0]  ;;  %v871_v6 = vld [vmem:[#allocation3 + $0x38] sm:$0xf0]  ;;  %v861_v12 = vld [vmem:[#allocation3 + $0x20] sm:$0xf] }
  0x18   :  { %495 = vmatpush.bf16.msrb.mxu2 %v886_v41  ;;  %544 = vmatpush.bf16.msrb.mxu3 %v950_v45  ;;  %v934_v7 = vor.u32 %v1004_v4, %v933_v2  ;;  %v874_v8 = vor.u32 %v987_v5, %v871_v6  ;;  %v986_v13 = vld [vmem:[#allocation3 + $0x24] sm:$0xf0]  ;;  %v925_v15 = vld [vmem:[#allocation3 + $0xa0] sm:$0xf]  ;;  %v985_v17 = vld [vmem:[#allocation3 + $0x24] sm:$0xf] }
  0x19   :  { %593 = vmatpush.bf16.msrb.mxu0 %v890_v46  ;;  %642 = vmatpush.bf16.msrb.mxu1 %v954_v50  ;;  %v862_v14 = vor.u32 %v986_v13, %v861_v12  ;;  %v1002_v16 = vld [vmem:[#allocation3 + $0xa4] sm:$0xf0]  ;;  %v863_v19 = vld [vmem:[#allocation3 + $0x28] sm:$0xf0]  ;;  %v1001_v20 = vld [vmem:[#allocation3 + $0xa4] sm:$0xf] }
  0x1a   :  { %v926_v18 = vor.u32 %v1002_v16, %v925_v15  ;;  %v927_v21 = vld [vmem:[#allocation3 + $0xa8] sm:$0xf0]  ;;  %v866_v22 = vor.u32 %v985_v17, %v863_v19  ;;  %v853_v24 = vld [vmem:[#allocation3 + $0x10] sm:$0xf]  ;;  %v984_v25 = vld [vmem:[#allocation3 + $0x14] sm:$0xf0] }
  0x1b   :  { %v930_v23 = vor.u32 %v1001_v20, %v927_v21  ;;  %v917_v26 = vld [vmem:[#allocation3 + $0x90] sm:$0xf]  ;;  %v854_v27 = vor.u32 %v984_v25, %v853_v24  ;;  %v1000_v28 = vld [vmem:[#allocation3 + $0x94] sm:$0xf0]  ;;  %v983_v29 = vld [vmem:[#allocation3 + $0x14] sm:$0xf] }
  0x1c   :  { %496 = vmatpush.bf16.msrb.mxu2 %v878_v55  ;;  %545 = vmatpush.bf16.msrb.mxu3 %v942_v59  ;;  %v855_v30 = vld [vmem:[#allocation3 + $0x18] sm:$0xf0]  ;;  %v918_v31 = vor.u32 %v1000_v28, %v917_v26  ;;  %v999_v33 = vld [vmem:[#allocation3 + $0x94] sm:$0xf]  ;;  %v845_v36 = vld [vmem:[#allocation3] sm:$0xf] }
  0x1d   :  { %594 = vmatpush.bf16.msrb.mxu0 %v882_v60  ;;  %643 = vmatpush.bf16.msrb.mxu1 %v946_v61  ;;  %v858_v32 = vor.u32 %v983_v29, %v855_v30  ;;  %v919_v34 = vld [vmem:[#allocation3 + $0x98] sm:$0xf0]  ;;  %v982_v37 = vld [vmem:[#allocation3 + $0x4] sm:$0xf0]  ;;  %v909_v38 = vld [vmem:[#allocation3 + $0x80] sm:$0xf] }
  0x1e   :  { %828 = vmatmul.msk.bf16.gmra.mxu0 %vm117_vm1, %v972_v9  ;;  %833 = vmatmul.msk.bf16.gmra.mxu2 %vm117_vm1, %v977_v58  ;;  %v922_v35 = vor.u32 %v999_v33, %v919_v34  ;;  %v846_v39 = vor.u32 %v982_v37, %v845_v36  ;;  %v998_v40 = vld [vmem:[#allocation3 + $0x84] sm:$0xf0]  ;;  %v981_v41 = vld [vmem:[#allocation3 + $0x4] sm:$0xf]  ;;  %v847_v42 = vld [vmem:[#allocation3 + $0x8] sm:$0xf0] }
  0x1f   :  { %836 = vmatmul.msk.bf16.gmra.mxu1 %vm117_vm1, %v972_v9  ;;  %841 = vmatmul.msk.bf16.gmra.mxu3 %vm117_vm1, %v977_v58  ;;  %v1003_v9 = vld [vmem:[#allocation3 + $0xb4] sm:$0xf]  ;;  %v910_v43 = vor.u32 %v998_v40, %v909_v38  ;;  %v850_v44 = vor.u32 %v981_v41, %v847_v42  ;;  %v997_v45 = vld [vmem:[#allocation3 + $0x84] sm:$0xf]  ;;  %v911_v46 = vld [vmem:[#allocation3 + $0x88] sm:$0xf0] }
  0x20   :  { %497 = vmatpush.bf16.msrb.mxu2 %v870_v3  ;;  %546 = vmatpush.bf16.msrb.mxu3 %v934_v7  ;;  %v914_v47 = vor.u32 %v997_v45, %v911_v46  ;;  %v63_v48 = vld [vmem:[%s1322_s2] sm:$0x3] }
  0x21   :  { %595 = vmatpush.bf16.msrb.mxu0 %v874_v8  ;;  %v1173_v51 = vperm.slane %v63_v48, 0  ;;  %v1175_v52 = vperm.slane %v63_v48, 1 }
  0x24   :  { %498 = vmatpush.bf16.msrb.mxu2 %v862_v14  ;;  %547 = vmatpush.bf16.msrb.mxu3 %v926_v18 }
  0x25   :  { %596 = vmatpush.bf16.msrb.mxu0 %v866_v22 }
  0x28   :  { %499 = vmatpush.bf16.msrb.mxu2 %v854_v27  ;;  %548 = vmatpush.bf16.msrb.mxu3 %v918_v31 }
  0x29   :  { %597 = vmatpush.bf16.msrb.mxu0 %v858_v32 }
  0x2c   :  { %500 = vmatpush.bf16.msrb.mxu2 %v846_v39  ;;  %549 = vmatpush.bf16.msrb.mxu3 %v910_v43 }
  0x2d   :  { %598 = vmatpush.bf16.msrb.mxu0 %v850_v44 }
  0x2e   :  { %829 = vmatmul.msk.bf16.gmra.mxu0 %vm117_vm1, %v973_v10  ;;  %834 = vmatmul.msk.bf16.gmra.mxu2 %vm117_vm1, %v978_v63 }
  0x2f   :  { %837 = vmatmul.msk.bf16.gmra.mxu1 %vm117_vm1, %v973_v10  ;;  %842 = vmatmul.msk.bf16.gmra.mxu3 %vm117_vm1, %v978_v63  ;;  %v935_v10 = vld [vmem:[#allocation3 + $0xb8] sm:$0xf0] }
  0x30   :  { %v938_v11 = vor.u32 %v1003_v9, %v935_v10 }
  0x32   :  { %644 = vmatpush.bf16.msrb.mxu1 %v938_v11 }
  0x36   :  { %645 = vmatpush.bf16.msrb.mxu1 %v930_v23 }
  0x3a   :  { %646 = vmatpush.bf16.msrb.mxu1 %v922_v35 }
  0x3e   :  { %830 = vmatmul.msk.bf16.gmra.mxu0 %vm117_vm1, %v974_v49  ;;  %647 = vmatpush.bf16.msrb.mxu1 %v914_v47 }
  0x3f   :  { %838 = vmatmul.msk.bf16.gmra.mxu1 %vm117_vm1, %v974_v49 }
  0x4e   :  { %831 = vmatmul.msk.bf16.gmra.mxu0 %vm117_vm1, %v975_v62 }
  0x4f   :  { %839 = vmatmul.msk.bf16.gmra.mxu1 %vm117_vm1, %v975_v62 }
  0x8b   :  { %v158_v49 = vpop.f32.mrf.mxu0 }
  0x8c   :  { %v207_v50 = vpop.f32.mrf.mxu1  ;;  %v159_v53 = vadd.f32 %v158_v49, %v1173_v51 }
  0x8d   :  { %v208_v54 = vadd.f32 %v207_v50, %v1175_v52 }
  0x8e   :  { %v247_v59 = vmax.f32 %v159_v53, 0.0 }
  0x8f   :  { %v248_v61 = vmax.f32 %v208_v54, 0.0 }
  0x91   :  { %v183_v44 = vpop.f32.mrf.mxu2 }
  0x92   :  { %v232_v46 = vpop.f32.mrf.mxu3 }
  0x93   :  { %v160_v55 = vpop.f32.mrf.mxu0 }
  0x94   :  { %v161_v56 = vadd.f32 %v160_v55, %v1173_v51  ;;  %v209_v57 = vpop.f32.mrf.mxu1 }
  0x95   :  { %v210_v58 = vadd.f32 %v209_v57, %v1175_v52 }
  0x96   :  { %v249_v60 = vmax.f32 %v161_v56, 0.0 }
  0x97   :  { %v250_v62 = vmax.f32 %v210_v58, 0.0 }
  0x98   :  { %v279_v63 = vpack.c.bf16 %v249_v60, %v247_v59 }
  0x99   :  { %v280_v0 = vpack.c.bf16 %v250_v62, %v248_v61  ;;  %v185_v55 = vpop.f32.mrf.mxu2 }
  0x9a   :  { %501 = vmatmul.bf16.vlgmr.msrb.gmra.mxu2 %v279_v63  ;;  %599 = vmatmul.bf16.vlgmr.msrb.gmra.mxu0 %v279_v63  ;;  %v234_v58 = vpop.f32.mrf.mxu3 }
  0x9b   :  { %550 = vmatmul.bf16.vlgmr.msrb.gmra.mxu3 %v280_v0  ;;  %648 = vmatmul.bf16.vlgmr.msrb.gmra.mxu1 %v280_v0  ;;  %v163_v1 = vpop.f32.mrf.mxu0  ;;  %v184_v0 = vadd.f32 %v183_v44, %v1173_v51 }
  0x9c   :  { %v212_v2 = vpop.f32.mrf.mxu1  ;;  %v164_v3 = vadd.f32 %v163_v1, %v1173_v51  ;;  %v186_v1 = vadd.f32 %v185_v55, %v1173_v51 }
  0x9d   :  { %v213_v4 = vadd.f32 %v212_v2, %v1175_v52 }
  0x9e   :  { %v251_v9 = vmax.f32 %v164_v3, 0.0  ;;  %v233_v3 = vadd.f32 %v232_v46, %v1175_v52 }
  0x9f   :  { %v252_v11 = vmax.f32 %v213_v4, 0.0  ;;  %v235_v4 = vadd.f32 %v234_v58, %v1175_v52 }
  0xa1   :  { %v188_v63 = vpop.f32.mrf.mxu2 }
  0xa2   :  { %v237_v2 = vpop.f32.mrf.mxu3 }
  0xa3   :  { %v165_v5 = vpop.f32.mrf.mxu0 }
  0xa4   :  { %v166_v6 = vadd.f32 %v165_v5, %v1173_v51  ;;  %v214_v7 = vpop.f32.mrf.mxu1  ;;  %v267_v5 = vmax.f32 %v184_v0, 0.0 }
  0xa5   :  { %v215_v8 = vadd.f32 %v214_v7, %v1175_v52  ;;  %v268_v7 = vmax.f32 %v233_v3, 0.0 }
  0xa6   :  { %v253_v10 = vmax.f32 %v166_v6, 0.0  ;;  %v269_v6 = vmax.f32 %v186_v1, 0.0 }
  0xa7   :  { %v254_v12 = vmax.f32 %v215_v8, 0.0  ;;  %v270_v8 = vmax.f32 %v235_v4, 0.0 }
  0xa8   :  { %v281_v13 = vpack.c.bf16 %v253_v10, %v251_v9  ;;  %v289_v9 = vpack.c.bf16 %v269_v6, %v267_v5 }
  0xa9   :  { %v282_v14 = vpack.c.bf16 %v254_v12, %v252_v11  ;;  %v290_v10 = vpack.c.bf16 %v270_v8, %v268_v7  ;;  %v190_v11 = vpop.f32.mrf.mxu2 }
  0xaa   :  { %506 = vmatmul.bf16.gmra.mxu2 %v281_v13  ;;  %604 = vmatmul.bf16.gmra.mxu0 %v281_v13  ;;  %v239_v12 = vpop.f32.mrf.mxu3  ;;  %v189_v13 = vadd.f32 %v188_v63, %v1173_v51 }
  0xab   :  { %555 = vmatmul.bf16.gmra.mxu3 %v282_v14  ;;  %653 = vmatmul.bf16.gmra.mxu1 %v282_v14  ;;  %v168_v15 = vpop.f32.mrf.mxu0  ;;  %v191_v14 = vadd.f32 %v190_v11, %v1173_v51 }
  0xac   :  { %v217_v16 = vpop.f32.mrf.mxu1  ;;  %v169_v17 = vadd.f32 %v168_v15, %v1173_v51  ;;  %v238_v15 = vadd.f32 %v237_v2, %v1175_v52 }
  0xad   :  { %v218_v18 = vadd.f32 %v217_v16, %v1175_v52  ;;  %v240_v16 = vadd.f32 %v239_v12, %v1175_v52 }
  0xae   :  { %v255_v23 = vmax.f32 %v169_v17, 0.0 }
  0xaf   :  { %v256_v25 = vmax.f32 %v218_v18, 0.0  ;;  %v271_v18 = vmax.f32 %v189_v13, 0.0 }
  0xb1   :  { %v193_v17 = vpop.f32.mrf.mxu2 }
  0xb3   :  { %v170_v19 = vpop.f32.mrf.mxu0 }
  0xb4   :  { %v171_v20 = vadd.f32 %v170_v19, %v1173_v51  ;;  %v219_v21 = vpop.f32.mrf.mxu1  ;;  %v273_v19 = vmax.f32 %v191_v14, 0.0 }
  0xb5   :  { %v220_v22 = vadd.f32 %v219_v21, %v1175_v52  ;;  %v272_v21 = vmax.f32 %v238_v15, 0.0 }
  0xb6   :  { %v257_v24 = vmax.f32 %v171_v20, 0.0  ;;  %v242_v20 = vpop.f32.mrf.mxu3 }
  0xb7   :  { %v258_v26 = vmax.f32 %v220_v22, 0.0  ;;  %v274_v22 = vmax.f32 %v240_v16, 0.0 }
  0xb8   :  { %v283_v27 = vpack.c.bf16 %v257_v24, %v255_v23  ;;  %v291_v23 = vpack.c.bf16 %v273_v19, %v271_v18 }
  0xb9   :  { %v284_v28 = vpack.c.bf16 %v258_v26, %v256_v25  ;;  %v292_v24 = vpack.c.bf16 %v274_v22, %v272_v21  ;;  %v195_v25 = vpop.f32.mrf.mxu2 }
  0xba   :  { %511 = vmatmul.bf16.gmra.mxu2 %v283_v27  ;;  %609 = vmatmul.bf16.gmra.mxu0 %v283_v27  ;;  %v194_v27 = vadd.f32 %v193_v17, %v1173_v51 }
  0xbb   :  { %560 = vmatmul.bf16.gmra.mxu3 %v284_v28  ;;  %658 = vmatmul.bf16.gmra.mxu1 %v284_v28  ;;  %v173_v29 = vpop.f32.mrf.mxu0  ;;  %v196_v28 = vadd.f32 %v195_v25, %v1173_v51 }
  0xbc   :  { %v222_v30 = vpop.f32.mrf.mxu1  ;;  %v174_v31 = vadd.f32 %v173_v29, %v1173_v51  ;;  %v243_v29 = vadd.f32 %v242_v20, %v1175_v52 }
  0xbd   :  { %v223_v32 = vadd.f32 %v222_v30, %v1175_v52 }
  0xbe   :  { %v259_v37 = vmax.f32 %v174_v31, 0.0  ;;  %v244_v26 = vpop.f32.mrf.mxu3  ;;  %v275_v31 = vmax.f32 %v194_v27, 0.0 }
  0xbf   :  { %v260_v39 = vmax.f32 %v223_v32, 0.0  ;;  %v245_v30 = vadd.f32 %v244_v26, %v1175_v52  ;;  %v277_v32 = vmax.f32 %v196_v28, 0.0 }
  0xc3   :  { %v175_v33 = vpop.f32.mrf.mxu0 }
  0xc4   :  { %v176_v34 = vadd.f32 %v175_v33, %v1173_v51  ;;  %v224_v35 = vpop.f32.mrf.mxu1  ;;  %v276_v33 = vmax.f32 %v243_v29, 0.0 }
  0xc5   :  { %v225_v36 = vadd.f32 %v224_v35, %v1175_v52  ;;  %v293_v35 = vpack.c.bf16 %v277_v32, %v275_v31 }
  0xc6   :  { %v261_v38 = vmax.f32 %v176_v34, 0.0  ;;  %v278_v34 = vmax.f32 %v245_v30, 0.0 }
  0xc7   :  { %v262_v40 = vmax.f32 %v225_v36, 0.0 }
  0xc8   :  { %v285_v41 = vpack.c.bf16 %v261_v38, %v259_v37  ;;  %v294_v36 = vpack.c.bf16 %v278_v34, %v276_v33  ;;  %v327_v37 = vld [vmem:[%s1324_s4] sm:$0x3] }
  0xc9   :  { %v286_v42 = vpack.c.bf16 %v262_v40, %v260_v39  ;;  %v1212_v38 = vperm.slane %v327_v37, 1 }
  0xca   :  { %516 = vmatmul.bf16.gmra.mxu2 %v285_v41  ;;  %614 = vmatmul.bf16.gmra.mxu0 %v285_v41  ;;  %v1217_v41 = vperm.slane %v327_v37, 0 }
  0xcb   :  { %565 = vmatmul.bf16.gmra.mxu3 %v286_v42  ;;  %663 = vmatmul.bf16.gmra.mxu1 %v286_v42  ;;  %v178_v43 = vpop.f32.mrf.mxu0 }
  0xcc   :  { %v227_v45 = vpop.f32.mrf.mxu1  ;;  %v179_v47 = vadd.f32 %v178_v43, %v1173_v51 }
  0xcd   :  { %v228_v48 = vadd.f32 %v227_v45, %v1175_v52 }
  0xce   :  { %v263_v56 = vmax.f32 %v179_v47, 0.0 }
  0xcf   :  { %v264_v59 = vmax.f32 %v228_v48, 0.0 }
  0xd3   :  { %v180_v49 = vpop.f32.mrf.mxu0 }
  0xd4   :  { %v181_v50 = vadd.f32 %v180_v49, %v1173_v51  ;;  %v229_v53 = vpop.f32.mrf.mxu1 }
  0xd5   :  { %v230_v54 = vadd.f32 %v229_v53, %v1175_v52 }
  0xd6   :  { %v265_v57 = vmax.f32 %v181_v50, 0.0 }
  0xd7   :  { %v266_v60 = vmax.f32 %v230_v54, 0.0 }
  0xd8   :  { %v287_v61 = vpack.c.bf16 %v265_v57, %v263_v56 }
  0xd9   :  { %v288_v62 = vpack.c.bf16 %v266_v60, %v264_v59 }
  0xda   :  { %521 = vmatmul.bf16.gmra.mxu2 %v287_v61  ;;  %619 = vmatmul.bf16.gmra.mxu0 %v287_v61 }
  0xdb   :  { %570 = vmatmul.bf16.gmra.mxu3 %v288_v62  ;;  %668 = vmatmul.bf16.gmra.mxu1 %v288_v62 }
  0xea   :  { %526 = vmatmul.bf16.gmra.mxu2 %v289_v9  ;;  %624 = vmatmul.bf16.gmra.mxu0 %v289_v9 }
  0xeb   :  { %575 = vmatmul.bf16.gmra.mxu3 %v290_v10  ;;  %673 = vmatmul.bf16.gmra.mxu1 %v290_v10 }
  0xfa   :  { %531 = vmatmul.bf16.gmra.mxu2 %v291_v23  ;;  %629 = vmatmul.bf16.gmra.mxu0 %v291_v23 }
  0xfb   :  { %580 = vmatmul.bf16.gmra.mxu3 %v292_v24  ;;  %678 = vmatmul.bf16.gmra.mxu1 %v292_v24 }
 0x10a   :  { %536 = vmatmul.bf16.gmra.mxu2 %v293_v35  ;;  %634 = vmatmul.bf16.gmra.mxu0 %v293_v35 }
 0x10b   :  { %585 = vmatmul.bf16.gmra.mxu3 %v294_v36  ;;  %683 = vmatmul.bf16.gmra.mxu1 %v294_v36 }
 0x117   :  { %v600_v51 = vpop.f32.mrf.mxu0 }
 0x118   :  { %v601_v39 = vadd.f32 %v600_v51, %v1212_v38  ;;  %v649_v52 = vpop.f32.mrf.mxu1 }
 0x11a   :  { %v1215_v40 = vadd.f32 %v649_v52, %v601_v39 }
 0x11d   :  { %v502_v42 = vpop.f32.mrf.mxu2 }
 0x11e   :  { %v503_v43 = vadd.f32 %v502_v42, %v1217_v41  ;;  %v551_v44 = vpop.f32.mrf.mxu3 }
 0x11f   :  { %v602_v45 = vpop.f32.mrf.mxu0 }
 0x120   :  { %v1220_v46 = vadd.f32 %v551_v44, %v503_v43  ;;  %v603_v47 = vadd.f32 %v602_v45, %v1212_v38  ;;  %v651_v48 = vpop.f32.mrf.mxu1 }
 0x122   :  { %v1223_v49 = vadd.f32 %v651_v48, %v603_v47 }
 0x125   :  { %v504_v50 = vpop.f32.mrf.mxu2 }
 0x126   :  { %v505_v53 = vadd.f32 %v504_v50, %v1217_v41  ;;  %v553_v54 = vpop.f32.mrf.mxu3 }
 0x127   :  { %v605_v55 = vpop.f32.mrf.mxu0 }
 0x128   :  { %v1226_v56 = vadd.f32 %v553_v54, %v505_v53  ;;  %v606_v57 = vadd.f32 %v605_v55, %v1212_v38  ;;  %v654_v58 = vpop.f32.mrf.mxu1 }
 0x12a   :  { %v1229_v59 = vadd.f32 %v654_v58, %v606_v57 }
 0x12d   :  { %v507_v60 = vpop.f32.mrf.mxu2 }
 0x12e   :  { %v508_v61 = vadd.f32 %v507_v60, %v1217_v41  ;;  %v556_v62 = vpop.f32.mrf.mxu3 }
 0x12f   :  { %v607_v63 = vpop.f32.mrf.mxu0 }
 0x130   :  { %v1232_v0 = vadd.f32 %v556_v62, %v508_v61  ;;  %v608_v1 = vadd.f32 %v607_v63, %v1212_v38  ;;  %v656_v2 = vpop.f32.mrf.mxu1 }
 0x132   :  { %v1235_v3 = vadd.f32 %v656_v2, %v608_v1 }
 0x135   :  { %v509_v4 = vpop.f32.mrf.mxu2 }
 0x136   :  { %v510_v5 = vadd.f32 %v509_v4, %v1217_v41  ;;  %v558_v6 = vpop.f32.mrf.mxu3 }
 0x137   :  { %v610_v7 = vpop.f32.mrf.mxu0 }
 0x138   :  { %v1238_v8 = vadd.f32 %v558_v6, %v510_v5  ;;  %v611_v9 = vadd.f32 %v610_v7, %v1212_v38  ;;  %v659_v10 = vpop.f32.mrf.mxu1 }
 0x13a   :  { %v1241_v11 = vadd.f32 %v659_v10, %v611_v9 }
 0x13d   :  { %v512_v12 = vpop.f32.mrf.mxu2 }
 0x13e   :  { %v513_v13 = vadd.f32 %v512_v12, %v1217_v41  ;;  %v561_v14 = vpop.f32.mrf.mxu3 }
 0x13f   :  { %v612_v15 = vpop.f32.mrf.mxu0 }
 0x140   :  { %v1244_v16 = vadd.f32 %v561_v14, %v513_v13  ;;  %v613_v17 = vadd.f32 %v612_v15, %v1212_v38  ;;  %v661_v18 = vpop.f32.mrf.mxu1 }
 0x142   :  { %v1247_v19 = vadd.f32 %v661_v18, %v613_v17 }
 0x145   :  { %v514_v20 = vpop.f32.mrf.mxu2 }
 0x146   :  { %v515_v21 = vadd.f32 %v514_v20, %v1217_v41  ;;  %v563_v22 = vpop.f32.mrf.mxu3 }
 0x147   :  { %v615_v23 = vpop.f32.mrf.mxu0 }
 0x148   :  { %v1250_v24 = vadd.f32 %v563_v22, %v515_v21  ;;  %v616_v25 = vadd.f32 %v615_v23, %v1212_v38  ;;  %v664_v26 = vpop.f32.mrf.mxu1 }
 0x14a   :  { %v1253_v27 = vadd.f32 %v664_v26, %v616_v25 }
 0x14d   :  { %v517_v28 = vpop.f32.mrf.mxu2 }
 0x14e   :  { %v518_v29 = vadd.f32 %v517_v28, %v1217_v41  ;;  %v566_v30 = vpop.f32.mrf.mxu3 }
 0x14f   :  { %v617_v31 = vpop.f32.mrf.mxu0 }
 0x150   :  { %v1256_v32 = vadd.f32 %v566_v30, %v518_v29  ;;  %v618_v33 = vadd.f32 %v617_v31, %v1212_v38  ;;  %v666_v34 = vpop.f32.mrf.mxu1 }
 0x152   :  { %v1259_v35 = vadd.f32 %v666_v34, %v618_v33 }
 0x155   :  { %v519_v36 = vpop.f32.mrf.mxu2 }
 0x156   :  { %v520_v37 = vadd.f32 %v519_v36, %v1217_v41  ;;  %v568_v51 = vpop.f32.mrf.mxu3 }
 0x157   :  { %v620_v39 = vpop.f32.mrf.mxu0 }
 0x158   :  { %v1262_v52 = vadd.f32 %v568_v51, %v520_v37  ;;  %v621_v42 = vadd.f32 %v620_v39, %v1212_v38  ;;  %v669_v43 = vpop.f32.mrf.mxu1 }
 0x15a   :  { %v1265_v44 = vadd.f32 %v669_v43, %v621_v42 }
 0x15d   :  { %v522_v45 = vpop.f32.mrf.mxu2 }
 0x15e   :  { %v523_v47 = vadd.f32 %v522_v45, %v1217_v41  ;;  %v571_v48 = vpop.f32.mrf.mxu3 }
 0x15f   :  { %v622_v50 = vpop.f32.mrf.mxu0 }
 0x160   :  { %v1268_v53 = vadd.f32 %v571_v48, %v523_v47  ;;  %v623_v54 = vadd.f32 %v622_v50, %v1212_v38  ;;  %v671_v55 = vpop.f32.mrf.mxu1 }
 0x162   :  { %v1271_v57 = vadd.f32 %v671_v55, %v623_v54 }
 0x165   :  { %v524_v58 = vpop.f32.mrf.mxu2 }
 0x166   :  { %v525_v60 = vadd.f32 %v524_v58, %v1217_v41  ;;  %v573_v61 = vpop.f32.mrf.mxu3 }
 0x167   :  { %v625_v62 = vpop.f32.mrf.mxu0 }
 0x168   :  { %v1274_v63 = vadd.f32 %v573_v61, %v525_v60  ;;  %v674_v1 = vpop.f32.mrf.mxu1 }
 0x16d   :  { %v527_v2 = vpop.f32.mrf.mxu2 }
 0x16e   :  { %v1276_v4 = vpop.f32.mrf.mxu3 }
 0x16f   :  { %v627_v5 = vpop.f32.mrf.mxu0 }
 0x170   :  { %v676_v6 = vpop.f32.mrf.mxu1  ;;  %v628_v58 = vadd.f32 %v627_v5, %v1212_v38 }
 0x175   :  { %v529_v7 = vpop.f32.mrf.mxu2 }
 0x176   :  { %v578_v9 = vpop.f32.mrf.mxu3 }
 0x177   :  { %v630_v10 = vpop.f32.mrf.mxu0 }
 0x178   :  { %v679_v12 = vpop.f32.mrf.mxu1  ;;  %v631_v43 = vadd.f32 %v630_v10, %v1212_v38  ;;  %v626_v10 = vadd.f32 %v625_v62, %v1212_v38 }
 0x17a   :  { %v680_v60 = vadd.f32 %v679_v12, %v631_v43  ;;  %v528_v12 = vadd.f32 %v527_v2, %v1217_v41  ;;  %v705_v2 = vmax.f32 %v1268_v53, 0.0  ;;  %v696_v53 = vmax.f32 %v1235_v3, 0.0  ;;  %v721_v3 = vld [vmem:[%s1325_s5] sm:$0x3] }
 0x17d   :  { %v532_v13 = vpop.f32.mrf.mxu2 }
 0x17e   :  { %v581_v14 = vpop.f32.mrf.mxu3 }
 0x17f   :  { %v632_v15 = vpop.f32.mrf.mxu0 }
 0x180   :  { %v681_v17 = vpop.f32.mrf.mxu1  ;;  %v633_v33 = vadd.f32 %v632_v15, %v1212_v38  ;;  %v533_v15 = vadd.f32 %v532_v13, %v1217_v41 }
 0x182   :  { %v682_v45 = vadd.f32 %v681_v17, %v633_v33  ;;  %v677_v17 = vadd.f32 %v676_v6, %v628_v58  ;;  %v708_v6 = vmax.f32 %v1271_v57, 0.0  ;;  %v703_v57 = vmax.f32 %v1262_v52, 0.0 }
 0x183   :  { %v694_v52 = vmax.f32 %v1229_v59, 0.0  ;;  %v691_v59 = vmax.f32 %v1226_v56, 0.0 }
 0x184   :  { %v716_v61 = vmax.f32 %v682_v45, 0.0  ;;  %v712_v5 = vmax.f32 %v677_v17, 0.0 }
 0x185   :  { %v534_v18 = vpop.f32.mrf.mxu2 }
 0x186   :  { %v583_v20 = vpop.f32.mrf.mxu3  ;;  %v535_v50 = vadd.f32 %v534_v18, %v1217_v41  ;;  %v530_v18 = vadd.f32 %v529_v7, %v1217_v41 }
 0x187   :  { %v635_v21 = vpop.f32.mrf.mxu0 }
 0x188   :  { %v684_v22 = vpop.f32.mrf.mxu1  ;;  %v636_v28 = vadd.f32 %v635_v21, %v1212_v38  ;;  %v584_v21 = vadd.f32 %v583_v20, %v535_v50 }
 0x18a   :  { %v685_v34 = vadd.f32 %v684_v22, %v636_v28  ;;  %v675_v28 = vadd.f32 %v674_v1, %v626_v10  ;;  %v706_v1 = vmax.f32 %v1265_v44, 0.0  ;;  %v701_v44 = vmax.f32 %v1256_v32, 0.0 }
 0x18b   :  { %v692_v32 = vmax.f32 %v1223_v49, 0.0  ;;  %v725_v49 = vperm.slane %v721_v3, 0 }
 0x18c   :  { %v718_v47 = vmax.f32 %v685_v34, 0.0  ;;  %v710_v20 = vmax.f32 %v675_v28, 0.0 }
 0x18d   :  { %v537_v23 = vpop.f32.mrf.mxu2 }
 0x18e   :  { %v586_v25 = vpop.f32.mrf.mxu3  ;;  %v538_v51 = vadd.f32 %v537_v23, %v1217_v41  ;;  %v714_v23 = vmax.f32 %v680_v60, 0.0 }
 0x18f   :  { %v637_v26 = vpop.f32.mrf.mxu0 }
 0x190   :  { %v638_v29 = vadd.f32 %v637_v26, %v1212_v38  ;;  %v686_v30 = vpop.f32.mrf.mxu1  ;;  %v587_v54 = vadd.f32 %v586_v25, %v538_v51  ;;  %v582_v25 = vadd.f32 %v581_v14, %v533_v15  ;;  %v715_v26 = vmax.f32 %v584_v21, 0.0 }
 0x191   :  { %v577_v38 = vadd.f32 %v1276_v4, %v528_v12  ;;  %v707_v14 = vmax.f32 %v1274_v63, 0.0  ;;  %v702_v4 = vmax.f32 %v1253_v27, 0.0  ;;  %v698_v63 = vmax.f32 %v1241_v11, 0.0 }
 0x192   :  { %v687_v31 = vadd.f32 %v686_v30, %v638_v29  ;;  %v717_v22 = vmax.f32 %v587_v54, 0.0  ;;  %v579_v29 = vadd.f32 %v578_v9, %v530_v18  ;;  %v713_v13 = vmax.f32 %v582_v25, 0.0 }
 0x193   :  { %v709_v7 = vmax.f32 %v577_v38, 0.0  ;;  %v700_v9 = vmax.f32 %v1247_v19, 0.0  ;;  %v697_v27 = vmax.f32 %v1244_v16, 0.0  ;;  %v695_v19 = vmax.f32 %v1238_v8, 0.0 }
 0x194   :  { %v720_v36 = vmax.f32 %v687_v31, 0.0  ;;  %v711_v62 = vmax.f32 %v579_v29, 0.0  ;;  %v693_v11 = vmax.f32 %v1232_v0, 0.0  ;;  %v726_v16 = vperm.slane %v721_v3, 1 }
 0x195   :  { %v539_v37 = vpop.f32.mrf.mxu2  ;;  %v689_v8 = vmax.f32 %v1220_v46, 0.0 }
 0x196   :  { %v540_v39 = vadd.f32 %v539_v37, %v1217_v41  ;;  %749 = vmatpush.xpose.msra.mxu3 %v720_v36  ;;  %v588_v42 = vpop.f32.mrf.mxu3  ;;  %v704_v41 = vmax.f32 %v1259_v35, 0.0  ;;  %v699_v35 = vmax.f32 %v1250_v24, 0.0  ;;  %v690_v24 = vmax.f32 %v1215_v40, 0.0 }
 0x197   :  { %v723_v40 = vstv %s1326_s6 }
 0x198   :  { %v589_v48 = vadd.f32 %v588_v42, %v540_v39 }
 0x19a   :  { %v719_v55 = vmax.f32 %v589_v48, 0.0  ;;  %750 = vmatpush.xpose.msra.mxu3 %v718_v47 }
 0x19c   :  { %729 = vmatpush.xpose.msra.mxu2 %v719_v55 }
 0x19e   :  { %751 = vmatpush.xpose.msra.mxu3 %v716_v61 }
 0x1a0   :  { %730 = vmatpush.xpose.msra.mxu2 %v717_v22 }
 0x1a2   :  { %752 = vmatpush.xpose.msra.mxu3 %v714_v23 }
 0x1a4   :  { %731 = vmatpush.xpose.msra.mxu2 %v715_v26 }
 0x1a6   :  { %753 = vmatpush.xpose.msra.mxu3 %v712_v5 }
 0x1a8   :  { %732 = vmatpush.xpose.msra.mxu2 %v713_v13 }
 0x1aa   :  { %754 = vmatpush.xpose.msra.mxu3 %v710_v20 }
 0x1ac   :  { %733 = vmatpush.xpose.msra.mxu2 %v711_v62 }
 0x1ae   :  { %755 = vmatpush.xpose.msra.mxu3 %v708_v6 }
 0x1b0   :  { %734 = vmatpush.xpose.msra.mxu2 %v709_v7 }
 0x1b2   :  { %756 = vmatpush.xpose.msra.mxu3 %v706_v1 }
 0x1b4   :  { %735 = vmatpush.xpose.msra.mxu2 %v707_v14 }
 0x1b6   :  { %757 = vmatpush.xpose.msra.mxu3 %v704_v41 }
 0x1b8   :  { %736 = vmatpush.xpose.msra.mxu2 %v705_v2 }
 0x1ba   :  { %758 = vmatpush.xpose.msra.mxu3 %v702_v4 }
 0x1bc   :  { %737 = vmatpush.xpose.msra.mxu2 %v703_v57 }
 0x1be   :  { %759 = vmatpush.xpose.msra.mxu3 %v700_v9 }
 0x1c0   :  { %738 = vmatpush.xpose.msra.mxu2 %v701_v44 }
 0x1c2   :  { %760 = vmatpush.xpose.msra.mxu3 %v698_v63 }
 0x1c4   :  { %739 = vmatpush.xpose.msra.mxu2 %v699_v35 }
 0x1c6   :  { %761 = vmatpush.xpose.msra.mxu3 %v696_v53 }
 0x1c8   :  { %740 = vmatpush.xpose.msra.mxu2 %v697_v27 }
 0x1ca   :  { %762 = vmatpush.xpose.msra.mxu3 %v694_v52 }
 0x1cc   :  { %741 = vmatpush.xpose.msra.mxu2 %v695_v19 }
 0x1ce   :  { %763 = vmatpush.xpose.msra.mxu3 %v692_v32 }
 0x1d0   :  { %742 = vmatpush.xpose.msra.mxu2 %v693_v11 }
 0x1d2   :  { %764 = vmatpush.xpose.msra.mxu3 %v690_v24 }
 0x1d4   :  { %743 = vmatpush.xpose.msra.mxu2 %v691_v59 }
 0x1d5   :  { %765 = vmatmul.f32.vlgmr.msra.gmra.mxu3 %v726_v16 }
 0x1d8   :  { %744 = vmatpush.xpose.msra.mxu2 %v689_v8 }
 0x1db   :  { %745 = vmatmul.f32.vlgmr.msra.gmra.mxu2 %v725_v49 }
 0x258   :  { %v766_v30 = vpop.f32.mrf.mxu3 }
 0x25e   :  { %v746_v0 = vpop.f32.mrf.mxu2 }
 0x25f   :  { %v747_v56 = vadd.f32 %v746_v0, %v723_v40 }
 0x261   :  { %v767_v31 = vadd.f32 %v766_v30, %v747_v56 }
 0x263   :  { %769 = vst [vmem:[#allocation6] sm:$0x1] %v767_v31 }
 0x264   :  { %780 = dma.vmem_to_hbm [thread:$0]  %s776_s3, 16, %s778_s14, [#allocation5]  }
 0x265   :  { %1069 = dma.done.wait [#allocation5], 16  }
 0x266   :  { %1070 = vsyncadd [#allocation5], 4294967280 }
 0x267   :  { %785 = vsyncpa [#allocation4], 1 }
 0x268   :  { %786 = vsyncpa [#allocation5], 1 }

</bundles_post_ra>
